<compile_context>
chip_gen: v7x
topology: tpu7x:2x2x1
jax: 0.10.0
libtpu: 0.0.40
codegen_flags: <defaults>
</compile_context>

<pallas_src>
import jax
import jax.numpy as jnp
from jax.experimental import pallas as pl
from jax.experimental.pallas import tpu as pltpu

C1_OUT = 32   # conv1 out channels
C2_OUT = 64   # conv2 out channels
K1 = 5        # conv1 kernel size (padding 2)
K2 = 3        # conv2 kernel size (padding 1)


def _conv1d_classifier_kernel(lens_ref,                       # SMEM (B_pad,) int32
                              xp_ref,                         # (BB, T+K1-1, C_in) bf16
                              w1_ref, b1_ref,                 # (K1*C_in, 32) bf16, (1, 32) f32
                              w2_ref, b2_ref,                 # (K2*32, 64) bf16, (1, 64) f32
                              wf_ref, bf_ref,                 # (64, NC) f32, (1, NC) f32
                              out_ref):                       # (BB, NC) f32
    BB, Tp, C_in = xp_ref.shape
    T = Tp - (K1 - 1)
    g = pl.program_id(0)

    # ---- validity mask from scalar-prefetched lengths (no mask DMA) ----
    t_iota = jax.lax.broadcasted_iota(jnp.int32, (1, T, 1), 1)
    rows = []
    for b in range(BB):                      # BB is a small static constant
        length_b = lens_ref[g * BB + b]
        rows.append(jnp.where(t_iota < length_b, 1.0, 0.0))
    mask = jnp.concatenate(rows, axis=0)     # (BB, T, 1) f32

    xp = xp_ref[...]                         # (BB, T+4, C_in) bf16

    # ---- conv1 (kernel 5, padding 2): im2col -> single MXU matmul ----
    cols1 = jnp.concatenate([xp[:, k:k + T, :] for k in range(K1)],
                            axis=-1)                              # (BB, T, K1*C_in)
    a1 = cols1.reshape(BB * T, K1 * C_in)                         # (BB*T, K1*C_in)
    y1 = jnp.dot(a1, w1_ref[...],
                 preferred_element_type=jnp.float32)              # (BB*T, 32) f32
    h1 = jnp.maximum(y1.reshape(BB, T, C1_OUT) + b1_ref[...], 0.0) * mask

    # ---- conv2 (kernel 3, padding 1): pad time in registers, im2col, matmul ----
    h1b = h1.astype(jnp.bfloat16)
    zrow = jnp.zeros((BB, 1, C1_OUT), jnp.bfloat16)
    h1p = jnp.concatenate([zrow, h1b, zrow], axis=1)              # (BB, T+2, 32)
    cols2 = jnp.concatenate([h1p[:, k:k + T, :] for k in range(K2)],
                            axis=-1)                              # (BB, T, K2*32)
    a2 = cols2.reshape(BB * T, K2 * C1_OUT)                       # (BB*T, 96)
    y2 = jnp.dot(a2, w2_ref[...],
                 preferred_element_type=jnp.float32)              # (BB*T, 64) f32
    h2 = jnp.maximum(y2.reshape(BB, T, C2_OUT) + b2_ref[...], 0.0) * mask

    # ---- masked mean pooling over time (mask already applied; 0/1 mask is
    #      idempotent, so this matches the reference's double application) ----
    pooled_sum = jnp.sum(h2, axis=1)                              # (BB, 64)
    counts = jnp.sum(mask, axis=1) + 1e-6                         # (BB, 1)
    pooled = pooled_sum / counts                                  # (BB, 64) f32

    # ---- final linear (tiny; keep in f32) ----
    out_ref[...] = (jnp.dot(pooled, wf_ref[...],
                            preferred_element_type=jnp.float32) + bf_ref[...])


def conv1d_classifier_forward(x, lengths, params, *, block_b=8):
    """x: (B, T, C_in) float32, lengths: (B,) int -> (B, num_classes) float32."""
    B, T, C_in = x.shape
    num_classes = params["bf"].shape[0]

    # Batch block: BB == B (single grid step) for small B, otherwise a multiple
    # of 8 so the (BB, num_classes) output block is sublane-aligned.
    BB = B if B < 8 else min(block_b, B) // 8 * 8 or 8
    B_pad = -(-B // BB) * BB

    # Glue (plain XLA): cast to bf16, zero-pad time for conv1, pad batch,
    # build tap-fused (im2col) weight layouts.
    x_bf = x.astype(jnp.bfloat16)
    x_pad = jnp.pad(x_bf, ((0, B_pad - B), (K1 // 2, K1 // 2), (0, 0)))
    lens_pad = jnp.pad(lengths.astype(jnp.int32), (0, B_pad - B))

    w1f = jnp.transpose(params["w1"], (2, 1, 0)).reshape(K1 * C_in, C1_OUT)
    w2f = jnp.transpose(params["w2"], (2, 1, 0)).reshape(K2 * C1_OUT, C2_OUT)
    w1f = w1f.astype(jnp.bfloat16)
    w2f = w2f.astype(jnp.bfloat16)
    b1k = params["b1"].reshape(1, C1_OUT).astype(jnp.float32)
    b2k = params["b2"].reshape(1, C2_OUT).astype(jnp.float32)
    wfk = params["wf"].T.astype(jnp.float32)
    bfk = params["bf"].reshape(1, num_classes).astype(jnp.float32)

    # VMEM footprint per step is ~2*BB*(T+4)*C_in*2B + fused weights + f32
    # intermediates -- tiny here; raise vmem_limit_bytes only if BB*T is pushed
    # far enough to exceed the default scoped limit (v7x budget: 64 MiB VMEM).
    out = pl.pallas_call(
        _conv1d_classifier_kernel,
        out_shape=jax.ShapeDtypeStruct((B_pad, num_classes), jnp.float32),
        grid_spec=pltpu.PrefetchScalarGridSpec(
            num_scalar_prefetch=1,
            grid=(B_pad // BB,),
            in_specs=[
                pl.BlockSpec((BB, T + K1 - 1, C_in), lambda g, lens: (g, 0, 0)),
                pl.BlockSpec((K1 * C_in, C1_OUT), lambda g, lens: (0, 0)),
                pl.BlockSpec((1, C1_OUT), lambda g, lens: (0, 0)),
                pl.BlockSpec((K2 * C1_OUT, C2_OUT), lambda g, lens: (0, 0)),
                pl.BlockSpec((1, C2_OUT), lambda g, lens: (0, 0)),
                pl.BlockSpec((C2_OUT, num_classes), lambda g, lens: (0, 0)),
                pl.BlockSpec((1, num_classes), lambda g, lens: (0, 0)),
            ],
            out_specs=pl.BlockSpec((BB, num_classes), lambda g, lens: (g, 0)),
        ),
        compiler_params=pltpu.CompilerParams(
            dimension_semantics=("parallel",)),
    )(lens_pad, x_pad, w1f, b1k, w2f, b2k, wfk, bfk)
    return out[:B]


def _reference_forward(x, lengths, params):
    """Pure-JAX f32 reference replicating the PyTorch forward exactly."""
    B, T, C_in = x.shape
    mask = (jnp.arange(T)[None, :] < lengths[:, None]).astype(jnp.float32)
    mask = mask[:, None, :]                                          # (B, 1, T)
    xt = jnp.transpose(x, (0, 2, 1))                                 # (B, C_in, T)
    h1 = jax.lax.conv_general_dilated(
        xt, params["w1"], (1,), [(2, 2)],
        dimension_numbers=("NCH", "OIH", "NCH"))
    h1 = jnp.maximum(h1 + params["b1"][None, :, None], 0.0) * mask
    h2 = jax.lax.conv_general_dilated(
        h1, params["w2"], (1,), [(1, 1)],
        dimension_numbers=("NCH", "OIH", "NCH"))
    h2 = jnp.maximum(h2 + params["b2"][None, :, None], 0.0) * mask
    masked_sum = jnp.sum(h2 * mask, axis=2)
    masked_count = jnp.sum(mask, axis=2) + 1e-6
    pooled = masked_sum / masked_count
    return pooled @ params["wf"].T + params["bf"]


def _init_params(key, input_channels, num_classes):
    """Deterministic init mirroring nn.Conv1d / nn.Linear shapes."""
    ks = jax.random.split(key, 6)

    def unif(k, shape, fan_in):
        bound = 1.0 / jnp.sqrt(fan_in)
        return jax.random.uniform(k, shape, jnp.float32, -bound, bound)

    return {
        "w1": unif(ks[0], (C1_OUT, input_channels, K1), input_channels * K1),
        "b1": unif(ks[1], (C1_OUT,), input_channels * K1),
        "w2": unif(ks[2], (C2_OUT, C1_OUT, K2), C1_OUT * K2),
        "b2": unif(ks[3], (C2_OUT,), C1_OUT * K2),
        "wf": unif(ks[4], (num_classes, C2_OUT), C2_OUT),
        "bf": unif(ks[5], (num_classes,), C2_OUT),
    }


if __name__ == "__main__":
    B, T, C_in, num_classes = 2, 16, 4, 2

    key = jax.random.PRNGKey(0)
    k_x, k_p = jax.random.split(key)
    x = jax.random.normal(k_x, (B, T, C_in), dtype=jnp.float32)
    lengths = jnp.array([16, 9], dtype=jnp.int32)
    params = _init_params(k_p, C_in, num_classes)

    out = conv1d_classifier_forward(x, lengths, params)
    out = jax.block_until_ready(out)

    ref = _reference_forward(x, lengths, params)
    assert out.shape == (B, num_classes)
    # bf16 activations/weights on the MXU path -> compare with a tolerance that
    # comfortably covers bf16 rounding but would catch any structural bug.
    assert jnp.allclose(out, ref, atol=3e-2, rtol=3e-2), (out, ref)

    print("KERNEL_OK")
</pallas_src>

<mosaic_0001>
module attributes {stable_mosaic.version = 11 : i64} {
  func.func @_conv1d_classifier_kernel(%arg0: i32, %arg1: memref<2xi32, #tpu.memory_space<smem>>, %arg2: memref<2x20x4xbf16, #tpu.memory_space<vmem>>, %arg3: memref<20x32xbf16, #tpu.memory_space<vmem>>, %arg4: memref<1x32xf32, #tpu.memory_space<vmem>>, %arg5: memref<96x64xbf16, #tpu.memory_space<vmem>>, %arg6: memref<1x64xf32, #tpu.memory_space<vmem>>, %arg7: memref<64x2xf32, #tpu.memory_space<vmem>>, %arg8: memref<1x2xf32, #tpu.memory_space<vmem>>, %arg9: memref<2x2xf32, #tpu.memory_space<vmem>>) attributes {dimension_semantics = [#tpu.dimension_semantics<parallel>], iteration_bounds = array<i64: 1>, scalar_prefetch = 1 : i64, scratch_operands = 0 : i64, tpu.core_type = #tpu.core_type<tc>, window_params = [{transform_indices = @transform_0, window_bounds = array<i64: 2, 20, 4>}, {pipeline_mode = #tpu.pipeline_mode<synchronous>, transform_indices = @transform_1, window_bounds = array<i64: 20, 32>}, {pipeline_mode = #tpu.pipeline_mode<synchronous>, transform_indices = @transform_2, window_bounds = array<i64: 1, 32>}, {pipeline_mode = #tpu.pipeline_mode<synchronous>, transform_indices = @transform_3, window_bounds = array<i64: 96, 64>}, {pipeline_mode = #tpu.pipeline_mode<synchronous>, transform_indices = @transform_4, window_bounds = array<i64: 1, 64>}, {pipeline_mode = #tpu.pipeline_mode<synchronous>, transform_indices = @transform_5, window_bounds = array<i64: 64, 2>}, {pipeline_mode = #tpu.pipeline_mode<synchronous>, transform_indices = @transform_6, window_bounds = array<i64: 1, 2>}, {transform_indices = @transform_7, window_bounds = array<i64: 2, 2>}]} {
    %0 = tpu.iota {dimensions = array<i32: 1>} : vector<1x16x1xi32>
    %c2_i32 = arith.constant 2 : i32
    %1 = arith.muli %arg0, %c2_i32 : i32
    %c0_i32 = arith.constant 0 : i32
    %2 = arith.addi %1, %c0_i32 : i32
    %3 = arith.index_cast %2 : i32 to index
    %4 = memref.load %arg1[%3] : memref<2xi32, #tpu.memory_space<smem>>
    %5 = vector.broadcast %4 : i32 to vector<1x16x1xi32>
    %6 = arith.cmpi slt, %0, %5 : vector<1x16x1xi32>
    %cst = arith.constant 1.000000e+00 : f32
    %cst_0 = arith.constant 0.000000e+00 : f32
    %7 = vector.broadcast %cst : f32 to vector<1x16x1xf32>
    %8 = vector.broadcast %cst_0 : f32 to vector<1x16x1xf32>
    %9 = arith.select %6, %7, %8 : vector<1x16x1xi1>, vector<1x16x1xf32>
    %c2_i32_1 = arith.constant 2 : i32
    %10 = arith.muli %arg0, %c2_i32_1 : i32
    %c1_i32 = arith.constant 1 : i32
    %11 = arith.addi %10, %c1_i32 : i32
    %12 = arith.index_cast %11 : i32 to index
    %13 = memref.load %arg1[%12] : memref<2xi32, #tpu.memory_space<smem>>
    %14 = vector.broadcast %13 : i32 to vector<1x16x1xi32>
    %15 = arith.cmpi slt, %0, %14 : vector<1x16x1xi32>
    %cst_2 = arith.constant 1.000000e+00 : f32
    %cst_3 = arith.constant 0.000000e+00 : f32
    %16 = vector.broadcast %cst_2 : f32 to vector<1x16x1xf32>
    %17 = vector.broadcast %cst_3 : f32 to vector<1x16x1xf32>
    %18 = arith.select %15, %16, %17 : vector<1x16x1xi1>, vector<1x16x1xf32>
    %19 = tpu.concatenate %9, %18 in 0 : vector<1x16x1xf32>, vector<1x16x1xf32> -> vector<2x16x1xf32>
    %c0 = arith.constant 0 : index
    %c0_4 = arith.constant 0 : index
    %c0_5 = arith.constant 0 : index
    %20 = vector.load %arg2[%c0, %c0_4, %c0_5] : memref<2x20x4xbf16, #tpu.memory_space<vmem>>, vector<2x20x4xbf16>
    %21 = vector.extract_strided_slice %20 {offsets = [0, 0, 0], sizes = [2, 16, 4], strides = [1, 1, 1]} : vector<2x20x4xbf16> to vector<2x16x4xbf16>
    %22 = vector.extract_strided_slice %20 {offsets = [0, 1, 0], sizes = [2, 16, 4], strides = [1, 1, 1]} : vector<2x20x4xbf16> to vector<2x16x4xbf16>
    %23 = vector.extract_strided_slice %20 {offsets = [0, 2, 0], sizes = [2, 16, 4], strides = [1, 1, 1]} : vector<2x20x4xbf16> to vector<2x16x4xbf16>
    %24 = vector.extract_strided_slice %20 {offsets = [0, 3, 0], sizes = [2, 16, 4], strides = [1, 1, 1]} : vector<2x20x4xbf16> to vector<2x16x4xbf16>
    %25 = vector.extract_strided_slice %20 {offsets = [0, 4, 0], sizes = [2, 16, 4], strides = [1, 1, 1]} : vector<2x20x4xbf16> to vector<2x16x4xbf16>
    %26 = tpu.concatenate %21, %22, %23, %24, %25 in 2 : vector<2x16x4xbf16>, vector<2x16x4xbf16>, vector<2x16x4xbf16>, vector<2x16x4xbf16>, vector<2x16x4xbf16> -> vector<2x16x20xbf16>
    %27 = vector.shape_cast %26 : vector<2x16x20xbf16> to vector<32x20xbf16>
    %c0_6 = arith.constant 0 : index
    %c0_7 = arith.constant 0 : index
    %28 = vector.load %arg3[%c0_6, %c0_7] : memref<20x32xbf16, #tpu.memory_space<vmem>>, vector<20x32xbf16>
    %cst_8 = arith.constant dense<0.000000e+00> : vector<32x32xf32>
    %29 = tpu.matmul %27, %28, %cst_8 {dimension_numbers = #tpu.dot_dimension_numbers<[1], [0], [0], [1], [0, 0, 1, 1], [], []>} : vector<32x20xbf16>, vector<20x32xbf16>, vector<32x32xf32> -> vector<32x32xf32>
    %30 = vector.shape_cast %29 : vector<32x32xf32> to vector<2x16x32xf32>
    %c0_9 = arith.constant 0 : index
    %c0_10 = arith.constant 0 : index
    %31 = vector.load %arg4[%c0_9, %c0_10] : memref<1x32xf32, #tpu.memory_space<vmem>>, vector<1x32xf32>
    %32 = vector.shape_cast %31 : vector<1x32xf32> to vector<1x1x32xf32>
    %33 = vector.broadcast %32 : vector<1x1x32xf32> to vector<2x16x32xf32>
    %34 = arith.addf %30, %33 : vector<2x16x32xf32>
    %cst_11 = arith.constant 0.000000e+00 : f32
    %35 = vector.broadcast %cst_11 : f32 to vector<2x16x32xf32>
    %36 = arith.maximumf %34, %35 : vector<2x16x32xf32>
    %37 = vector.broadcast %19 : vector<2x16x1xf32> to vector<2x16x32xf32>
    %38 = arith.mulf %36, %37 : vector<2x16x32xf32>
    %39 = arith.truncf %38 : vector<2x16x32xf32> to vector<2x16x32xbf16>
    %cst_12 = arith.constant 0.000000e+00 : bf16
    %40 = vector.broadcast %cst_12 : bf16 to vector<2x1x32xbf16>
    %41 = tpu.concatenate %40, %39, %40 in 1 : vector<2x1x32xbf16>, vector<2x16x32xbf16>, vector<2x1x32xbf16> -> vector<2x18x32xbf16>
    %42 = vector.extract_strided_slice %41 {offsets = [0, 0, 0], sizes = [2, 16, 32], strides = [1, 1, 1]} : vector<2x18x32xbf16> to vector<2x16x32xbf16>
    %43 = vector.extract_strided_slice %41 {offsets = [0, 1, 0], sizes = [2, 16, 32], strides = [1, 1, 1]} : vector<2x18x32xbf16> to vector<2x16x32xbf16>
    %44 = vector.extract_strided_slice %41 {offsets = [0, 2, 0], sizes = [2, 16, 32], strides = [1, 1, 1]} : vector<2x18x32xbf16> to vector<2x16x32xbf16>
    %45 = tpu.concatenate %42, %43, %44 in 2 : vector<2x16x32xbf16>, vector<2x16x32xbf16>, vector<2x16x32xbf16> -> vector<2x16x96xbf16>
    %46 = vector.shape_cast %45 : vector<2x16x96xbf16> to vector<32x96xbf16>
    %c0_13 = arith.constant 0 : index
    %c0_14 = arith.constant 0 : index
    %47 = vector.load %arg5[%c0_13, %c0_14] : memref<96x64xbf16, #tpu.memory_space<vmem>>, vector<96x64xbf16>
    %cst_15 = arith.constant dense<0.000000e+00> : vector<32x64xf32>
    %48 = tpu.matmul %46, %47, %cst_15 {dimension_numbers = #tpu.dot_dimension_numbers<[1], [0], [0], [1], [0, 0, 1, 1], [], []>} : vector<32x96xbf16>, vector<96x64xbf16>, vector<32x64xf32> -> vector<32x64xf32>
    %49 = vector.shape_cast %48 : vector<32x64xf32> to vector<2x16x64xf32>
    %c0_16 = arith.constant 0 : index
    %c0_17 = arith.constant 0 : index
    %50 = vector.load %arg6[%c0_16, %c0_17] : memref<1x64xf32, #tpu.memory_space<vmem>>, vector<1x64xf32>
    %51 = vector.shape_cast %50 : vector<1x64xf32> to vector<1x1x64xf32>
    %52 = vector.broadcast %51 : vector<1x1x64xf32> to vector<2x16x64xf32>
    %53 = arith.addf %49, %52 : vector<2x16x64xf32>
    %cst_18 = arith.constant 0.000000e+00 : f32
    %54 = vector.broadcast %cst_18 : f32 to vector<2x16x64xf32>
    %55 = arith.maximumf %53, %54 : vector<2x16x64xf32>
    %56 = vector.broadcast %19 : vector<2x16x1xf32> to vector<2x16x64xf32>
    %57 = arith.mulf %55, %56 : vector<2x16x64xf32>
    %cst_19 = arith.constant dense<0.000000e+00> : vector<2x64xf32>
    %58 = vector.multi_reduction <add>, %57, %cst_19 [1] : vector<2x16x64xf32> to vector<2x64xf32>
    %cst_20 = arith.constant dense<0.000000e+00> : vector<2x1xf32>
    %59 = vector.multi_reduction <add>, %19, %cst_20 [1] : vector<2x16x1xf32> to vector<2x1xf32>
    %cst_21 = arith.constant 9.99999997E-7 : f32
    %60 = vector.broadcast %cst_21 : f32 to vector<2x1xf32>
    %61 = arith.addf %59, %60 : vector<2x1xf32>
    %62 = vector.broadcast %61 : vector<2x1xf32> to vector<2x64xf32>
    %63 = arith.divf %58, %62 : vector<2x64xf32>
    %c0_22 = arith.constant 0 : index
    %c0_23 = arith.constant 0 : index
    %64 = vector.load %arg7[%c0_22, %c0_23] : memref<64x2xf32, #tpu.memory_space<vmem>>, vector<64x2xf32>
    %cst_24 = arith.constant dense<0.000000e+00> : vector<2x2xf32>
    %65 = tpu.matmul %63, %64, %cst_24 {dimension_numbers = #tpu.dot_dimension_numbers<[1], [0], [0], [1], [0, 0, 1, 1], [], []>} : vector<2x64xf32>, vector<64x2xf32>, vector<2x2xf32> -> vector<2x2xf32>
    %c0_25 = arith.constant 0 : index
    %c0_26 = arith.constant 0 : index
    %66 = vector.load %arg8[%c0_25, %c0_26] : memref<1x2xf32, #tpu.memory_space<vmem>>, vector<1x2xf32>
    %67 = vector.broadcast %66 : vector<1x2xf32> to vector<2x2xf32>
    %68 = arith.addf %65, %67 : vector<2x2xf32>
    %c0_27 = arith.constant 0 : index
    %c0_28 = arith.constant 0 : index
    %69 = vector.load %arg9[%c0_27, %c0_28] : memref<2x2xf32, #tpu.memory_space<vmem>>, vector<2x2xf32>
    tpu.vector_store %arg9[%c0_27, %c0_28], %68 {strides = array<i32>} : memref<2x2xf32, #tpu.memory_space<vmem>>, vector<2x2xf32>,
    return
  }
  func.func @transform_0(%arg0: i32, %arg1: memref<2xi32, #tpu.memory_space<smem>>) -> (i32, i32, i32) {
    %c0_i32 = arith.constant 0 : i32
    %c0_i32_0 = arith.constant 0 : i32
    %c0_i32_1 = arith.constant 0 : i32
    return %arg0, %c0_i32, %c0_i32_0 : i32, i32, i32
  }
  func.func @transform_1(%arg0: i32, %arg1: memref<2xi32, #tpu.memory_space<smem>>) -> (i32, i32) {
    %c0_i32 = arith.constant 0 : i32
    %c0_i32_0 = arith.constant 0 : i32
    %c0_i32_1 = arith.constant 0 : i32
    return %c0_i32, %c0_i32_0 : i32, i32
  }
  func.func @transform_2(%arg0: i32, %arg1: memref<2xi32, #tpu.memory_space<smem>>) -> (i32, i32) {
    %c0_i32 = arith.constant 0 : i32
    %c0_i32_0 = arith.constant 0 : i32
    %c0_i32_1 = arith.constant 0 : i32
    return %c0_i32, %c0_i32_0 : i32, i32
  }
  func.func @transform_3(%arg0: i32, %arg1: memref<2xi32, #tpu.memory_space<smem>>) -> (i32, i32) {
    %c0_i32 = arith.constant 0 : i32
    %c0_i32_0 = arith.constant 0 : i32
    %c0_i32_1 = arith.constant 0 : i32
    return %c0_i32, %c0_i32_0 : i32, i32
  }
  func.func @transform_4(%arg0: i32, %arg1: memref<2xi32, #tpu.memory_space<smem>>) -> (i32, i32) {
    %c0_i32 = arith.constant 0 : i32
    %c0_i32_0 = arith.constant 0 : i32
    %c0_i32_1 = arith.constant 0 : i32
    return %c0_i32, %c0_i32_0 : i32, i32
  }
  func.func @transform_5(%arg0: i32, %arg1: memref<2xi32, #tpu.memory_space<smem>>) -> (i32, i32) {
    %c0_i32 = arith.constant 0 : i32
    %c0_i32_0 = arith.constant 0 : i32
    %c0_i32_1 = arith.constant 0 : i32
    return %c0_i32, %c0_i32_0 : i32, i32
  }
  func.func @transform_6(%arg0: i32, %arg1: memref<2xi32, #tpu.memory_space<smem>>) -> (i32, i32) {
    %c0_i32 = arith.constant 0 : i32
    %c0_i32_0 = arith.constant 0 : i32
    %c0_i32_1 = arith.constant 0 : i32
    return %c0_i32, %c0_i32_0 : i32, i32
  }
  func.func @transform_7(%arg0: i32, %arg1: memref<2xi32, #tpu.memory_space<smem>>) -> (i32, i32) {
    %c0_i32 = arith.constant 0 : i32
    %c0_i32_0 = arith.constant 0 : i32
    return %arg0, %c0_i32 : i32, i32
  }
}

</mosaic_0001>

<bundles_post_ra>
// kernel: tpu_custom_call.1
= control target key start
LH: loop header
LB: loop body
LE: loop exit
PB: predicated region body
PF: predicated region fallthrough
CT: control target
= control target key end

     0   :  { %s1052_s0 = inlined_call_operand.vmem [shape: s32[2], index: 0, kind: input, shape index: {}]   ;;  %s1053_s1 = inlined_call_operand.vmem [shape: bf16[2,20,4], index: 1, kind: input, shape index: {}]   ;;  %s1054_s2 = inlined_call_operand.vmem [shape: bf16[20,32], index: 2, kind: input, shape index: {}]   ;;  %s1055_s3 = inlined_call_operand.vmem [shape: f32[1,32], index: 3, kind: input, shape index: {}]   ;;  %s1056_s4 = inlined_call_operand.vmem [shape: bf16[96,64], index: 4, kind: input, shape index: {}]   ;;  %s1057_s5 = inlined_call_operand.vmem [shape: f32[1,64], index: 5, kind: input, shape index: {}]   ;;  %s1058_s6 = inlined_call_operand.vmem [shape: f32[64,2], index: 6, kind: input, shape index: {}]   ;;  %s1059_s7 = inlined_call_operand.vmem [shape: f32[1,2], index: 7, kind: input, shape index: {}]   ;;  %s1060_s8 = inlined_call_operand.hbm [shape: f32[2,2], index: 8, kind: output, shape index: {}]  }
   0x1   :  { %s13_s29 = sshll.u32 %s1052_s0, 4  ;;  %s14_s29 = int_to_ptr.vmem [resolvable:$true] %s13_s29 }
   0x2   :  { %s775_s30 = scalar_lea.vmem %s14_s29, 16  ;;  %p780_p1 = scmp.lt.s32.totalorder %s14_s29, %s14_s29 }
   0x3   :  { %p776_p0 = scmp.ne.s32.totalorder %s14_s29, %s775_s30  ;;  %p781_p2 = scmp.lt.s32.totalorder %s775_s30, %s775_s30 }
   0x5   :  { %p782_p3 = por %p781_p2, %p780_p1 }
   0x7   :  { %p783_p4 = pnand %p782_p3, %p776_p0 }
   0x9   :  { %786 = shalt.err (!%p783_p4)  }
   0xa   :  { %s813_s9 = smov [#allocation3]  }
   0xb   :  { %16 = dma.vmem_to_smem %s14_s29, 16, %s813_s9, [#allocation2] }
   0xc   :  { %809 = dma.done.wait [#allocation2], 16 }
   0xd   :  { %810 = vsyncadd [#allocation2], 4294967280 }
   0xe   :  { %18 = sfence }
   0xf   :  { %v876_v0 = vld [vmem:[%s1053_s1] sm:$0xff]   ;;  %v881_v1 = vld [vmem:[%s1053_s1 + $0x8] ss:$0 sps:$4 sm:$0x33]   ;;  %vm103_vm0 = vcmask 1046528   ;;  %v888_v4 = vld [vmem:[%s1053_s1 + $0xc] sm:$0xff]   ;;  %v35_v47 = vlaneseq }
  0x10   :  { %v104_v2 = vrot.slane %v876_v0, 1  ;;  %v105_v3 = vrot.slane %v881_v1, 1  ;;  %v762_v5 = vld [vmem:[%s1053_s1 + $0x14] ss:$0 sps:$4 sm:$0x33]   ;;  %v76_v6 = vshrl.u32 %v876_v0, 16 }
  0x11   :  { %vm74_vm1 = vsmask.f32 7424  ;;  %v78_v7 = vshll.u32 %v876_v0, 16  ;;  %v83_v8 = vshll.u32 %v881_v1, 16  ;;  %v107_v10 = vrot.slane %v888_v4, 1  ;;  %v763_v13 = vld [vmem:[%s1054_s2] sm:$0xff]  }
  0x12   :  { %v106_v9 = vsel %vm103_vm0, %v104_v2, %v105_v3  ;;  %v108_v11 = vrot.slane %v762_v5, 1  ;;  %v88_v12 = vshrl.u32 %v888_v4, 16  ;;  %s814_s19 = smov 8   ;;  %v90_v16 = vshll.u32 %v888_v4, 16  ;;  %679 = vmatprep.subr.bf16.mxu0 %v763_v13  ;;  %s815_s21 = smov 4  }
  0x13   :  { %110 = vrot.lane.b32.xlu1 %v106_v9, %s814_s19  ;;  %v80_v14 = vrot.slane %v78_v7, 1  ;;  %v85_v15 = vrot.slane %v83_v8, 1  ;;  %v95_v17 = vshll.u32 %v762_v5, 16  ;;  %vm114_vm2 = vsmask.f32 6400  ;;  %680 = vmatpush3.bf16.msra.mxu0 %v763_v13  ;;  %s911_s22 = sld [smem:[#allocation3 + $0x1]] }
  0x14   :  { %v109_v18 = vsel %vm103_vm0, %v107_v10, %v108_v11  ;;  %v124_v19 = vrot.slane %v88_v12, 1  ;;  %v127_v20 = vshrl.u32 %v762_v5, 16  ;;  %v125_v22 = vrot.slane %v90_v16, 2  ;;  %v764_v32 = vld [vmem:[%s1054_s2 + $0x8] ss:$0 sps:$4 sm:$0x33]  }
  0x15   :  { %v81_v21 = vor.u32 %v80_v14, %v76_v6  ;;  %v130_v23 = vrot.slane %v95_v17, 2  ;;  %v92_v24 = vrot.slane %v90_v16, 1  ;;  %v97_v26 = vrot.slane %v95_v17, 1  ;;  %s913_s23 = sld [smem:[#allocation3]]  ;;  %s816_s2 = smov 12  }
  0x16   :  { %v129_v25 = vrot.slane %v127_v20, 1  ;;  %v141_v27 = vrot.slane %v888_v4, 2  ;;  %v126_v29 = vor.u32 %v125_v22, %v124_v19  ;;  %v142_v31 = vrot.slane %v762_v5, 2  ;;  %s818_s24 = smov 16  }
  0x17   :  { %112 = vrot.lane.b32.xlu1 %v109_v18, %s814_s19  ;;  %v86_v28 = vsel %vm74_vm1, %v81_v21, %v85_v15  ;;  %v93_v30 = vor.u32 %v92_v24, %v88_v12  ;;  %v115_v34 = vrot.slane %v76_v6, 1  ;;  %v116_v35 = vrot.slane %v78_v7, 2 }
  0x18   :  { %99 = vrot.lane.b32.xlu0 %v86_v28, %s815_s21  ;;  %v131_v33 = vor.u32 %v130_v23, %v129_v25  ;;  %v118_v36 = vshrl.u32 %v881_v1, 16  ;;  %vm137_vm3 = vcmask 1045504   ;;  %v121_v38 = vrot.slane %v83_v8, 2 }
  0x19   :  { %v98_v37 = vsel %vm74_vm1, %v93_v30, %v97_v26  ;;  %v117_v40 = vor.u32 %v116_v35, %v115_v34  ;;  %v143_v42 = vsel %vm137_vm3, %v141_v27, %v142_v31  ;;  %v138_v44 = vrot.slane %v876_v0, 2 }
  0x1a   :  { %v132_v39 = vsel %vm114_vm2, %v126_v29, %v131_v33  ;;  %v120_v41 = vrot.slane %v118_v36, 1  ;;  %vm185_vm4 = vcmask 1041408   ;;  %v139_v45 = vrot.slane %v881_v1, 2 }
  0x1b   :  { %135 = vrot.lane.b32.xlu1 %v132_v39, %s816_s2  ;;  %734 = vmatprep.subr.msk.bf16.mxu0 %vm185_vm4, %v764_v32  ;;  %v187_v46 = vsel %vm185_vm4, %v764_v32, 0  ;;  %v817_v49 = vmov 0   ;;  %v36_v50 = vshrl.u32 %v35_v47, 7  ;;  %v47_v51 = vstv %s911_s22 }
  0x1c   :  { %101 = vrot.lane.b32.xlu0 %v98_v37, %s815_s21  ;;  %v122_v43 = vor.u32 %v121_v38, %v120_v41  ;;  %682 = vmatpush3.bf16.msra.mxu0 %v187_v46  ;;  %v40_v52 = vstv %s913_s23  ;;  %vm495_vm5 = vcmask 7168  }
  0x1d   :  { %753 = vset.pattern.permute.xlu1 %v817_v49  ;;  %747 = vset.pattern.permute.xlu0 %v817_v49 }
  0x1e   :  { %v123_v48 = vsel %vm114_vm2, %v117_v40, %v122_v43 }
  0x1f   :  { %146 = vrot.lane.b32.xlu1 %v143_v42, %s818_s24 }
  0x20   :  { %133 = vrot.lane.b32.xlu0 %v123_v48, %s816_s2 }
  0x21   :  { %19 = vsyncpa [#allocation5], 0  ;;  %v140_v53 = vsel %vm137_vm3, %v138_v44, %v139_v45  ;;  %v37_v54 = vadd.s32 8, %v36_v50  ;;  %vm48_vm6 = vcmp.lt.s32.totalorder %v36_v50, %v47_v51  ;;  %vm41_vm7 = vcmp.lt.s32.totalorder %v36_v50, %v40_v52  ;;  %v767_v22 = vld [vmem:[%s1056_s4 + $0x10] sm:$0xff]   ;;  %v768_v23 = vld [vmem:[%s1056_s4 + $0x18] sm:$0xff]   ;;  %s821_s15 = smov 64  }
  0x22   :  { %v819_v55 = vmov 0.0   ;;  %vm148_vm10 = vcmask 31744   ;;  %vm153_vm11 = vcmask 64512   ;;  %vm158_vm12 = vcmask 97280   ;;  %v769_v24 = vld [vmem:[%s1056_s4 + $0x20] sm:$0xff]   ;;  %s824_s10 = smov [#allocation4]  }
  0x23   :  { %v50_v56 = vsel %vm48_vm6, 1.0, %v819_v55  ;;  %v43_v57 = vsel %vm41_vm7, 1.0, %v819_v55  ;;  %vm49_vm8 = vcmp.lt.s32.totalorder %v37_v54, %v47_v51  ;;  %vm42_vm9 = vcmp.lt.s32.totalorder %v37_v54, %v40_v52  ;;  %v646_v25 = vld [vmem:[%s1055_s3] ss:$0 sm:$0xff]  ;;  %s629_s11 = sshll.u32 %s824_s10, 4  ;;  %s630_s11 = int_to_ptr.vmem [resolvable:$true] %s629_s11 }
  0x24   :  { %v505_v58 = vsel %vm495_vm5, %v50_v56, 0.0  ;;  %v496_v59 = vsel %vm495_vm5, %v43_v57, 0.0  ;;  %144 = vrot.lane.b32.xlu0 %v140_v53, %s818_s24  ;;  %v51_v60 = vsel %vm49_vm8, 1.0, %v819_v55  ;;  %v44_v61 = vsel %vm42_vm9, 1.0, %v819_v55  ;;  %s787_s12 = scalar_lea.vmem %s630_s11, 32  ;;  %p792_p6 = scmp.lt.s32.totalorder %s630_s11, %s630_s11 }
  0x25   :  { %v754_v62 = vpack.i.bf16 %v51_v60, %v50_v56  ;;  %v506_v63 = vsel %vm495_vm5, %v51_v60, 0.0  ;;  %v748_v1 = vpack.i.bf16 %v44_v61, %v43_v57  ;;  %v497_v2 = vsel %vm495_vm5, %v44_v61, 0.0  ;;  %v770_v61 = vld [vmem:[%s1056_s4 + $0x28] sm:$0xff]   ;;  %p788_p5 = scmp.ne.s32.totalorder %s630_s11, %s787_s12  ;;  %p793_p7 = scmp.lt.s32.totalorder %s787_s12, %s787_s12 }
  0x26   :  { %v931_v3 = vadd.f32 %v506_v63, %v505_v58  ;;  %v933_v5 = vadd.f32 %v497_v2, %v496_v59  ;;  %vm163_vm13 = vcmask 130048   ;;  %vm180_vm14 = vcmask 162816  }
  0x27   :  { %755 = vperm.xlu1 %753, %v754_v62   ;;  %vm297_vm15 = vcmask 1040384   ;;  %vm298_vm2 = vsmask.f32 256  ;;  %vm351_vm4 = vcmask 523264   ;;  %vm404_vm5 = vcmask 785408   ;;  %p794_p8 = por %p793_p7, %p792_p6 }
  0x28   :  { %749 = vperm.xlu0 %747, %v748_v1   ;;  %v508_v42 = vrot.slane %v931_v3, 4  ;;  %v499_v44 = vrot.slane %v933_v5, 4  ;;  %vm975_vm3 = vmand %vm297_vm15, %vm298_vm2  ;;  %vm547_vm6 = vcmask 1041409   ;;  %vm621_vm7 = vcmask 9216  }
  0x29   :  { %p795_p9 = pnand %p794_p8, %p788_p5 }
  0x2a   :  { %v509_v51 = vadd.f32 %v508_v42, %v931_v3  ;;  %v500_v53 = vadd.f32 %v499_v44, %v933_v5 }
  0x2c   :  { %v510_v60 = vrot.slane %v509_v51, 2  ;;  %v501_v1 = vrot.slane %v500_v53, 2 }
  0x85   :  { %v111_v6 = vpop.permute.xlu1 %110 }
  0x89   :  { %v113_v7 = vpop.permute.xlu1 %112 }
  0x8a   :  { %v100_v8 = vpop.permute.xlu0 %99 }
  0x8b   :  { %v150_v12 = vsel %vm148_vm10, %v876_v0, %v100_v8  ;;  %v766_v0 = vld [vmem:[%s1056_s4 + $0x8] sm:$0xff]   ;;  %v511_v8 = vadd.f32 %v510_v60, %v509_v51  ;;  %v536_v60 = vld [vmem:[%s1058_s6 + $0x30] sm:$0xff] }
  0x8c   :  { %v155_v17 = vsel %vm153_vm11, %v150_v12, %v111_v6  ;;  %v502_v12 = vadd.f32 %v501_v1, %v500_v53  ;;  %v532_v53 = vld [vmem:[%s1058_s6 + $0x10] sm:$0xff] }
  0x8d   :  { %v136_v10 = vpop.permute.xlu1 %135 }
  0x8e   :  { %v102_v9 = vpop.permute.xlu0 %101 }
  0x8f   :  { %v152_v11 = vsel %vm148_vm10, %v888_v4, %v102_v9  ;;  %v765_v4 = vld [vmem:[%s1056_s4] sm:$0xff]   ;;  %s820_s4 = smov 32  }
  0x90   :  { %v157_v13 = vsel %vm153_vm11, %v152_v11, %v113_v7  ;;  %687 = vmatprep.subr.bf16.mxu1 %v765_v4 }
  0x91   :  { %v147_v15 = vpop.permute.xlu1 %146  ;;  %v162_v16 = vsel %vm158_vm12, %v157_v13, %v136_v10  ;;  %688 = vmatpush3.bf16.msra.mxu1 %v765_v4  ;;  %v503_v4 = vrot.slane %v502_v12, 1 }
  0x92   :  { %v134_v14 = vpop.permute.xlu0 %133  ;;  %v167_v21 = vsel %vm163_vm13, %v162_v16, %v147_v15  ;;  %689 = vmatprep.subr.bf16.mxu1 %v766_v0 }
  0x93   :  { %v160_v18 = vsel %vm158_vm12, %v155_v17, %v134_v14 }
  0x95   :  { %690 = vmatpush3.bf16.msra.mxu1 %v766_v0 }
  0x96   :  { %v145_v19 = vpop.permute.xlu0 %144  ;;  %691 = vmatprep.subr.bf16.mxu1 %v767_v22 }
  0x97   :  { %v165_v20 = vsel %vm163_vm13, %v160_v18, %v145_v19  ;;  %v512_v19 = vrot.slane %v511_v8, 1 }
  0x98   :  { %683 = vmatprep.mubr.msk.bf16.mxu0 %vm180_vm14, %v165_v20 }
  0x99   :  { %684 = vmatmul.mubr.msk.bf16.vlgmr.msra.gmra.mrb[0].mxu0 %vm180_vm14, %v167_v21  ;;  %692 = vmatpush3.bf16.msra.mxu1 %v767_v22 }
  0x9a   :  { %693 = vmatprep.subr.bf16.mxu1 %v768_v23 }
  0x9d   :  { %694 = vmatpush3.bf16.msra.mxu1 %v768_v23 }
  0x9e   :  { %695 = vmatprep.subr.bf16.mxu1 %v769_v24 }
  0xa1   :  { %696 = vmatpush3.bf16.msra.mxu1 %v769_v24 }
  0xa2   :  { %697 = vmatprep.subr.bf16.mxu1 %v770_v61 }
  0xa5   :  { %698 = vmatpush3.bf16.msra.mxu1 %v770_v61  ;;  %v537_v61 = vld [vmem:[%s1058_s6 + $0x38] sm:$0xff] }
  0xa6   :  { %v955_v27 = vpop.permute.xlu1 %755 }
  0xa7   :  { %v957_v30 = vpop.permute.xlu0 %749  ;;  %v758_v35 = vunpack.i.h.bf16 %v955_v27  ;;  %v757_v36 = vunpack.i.l.bf16 %v955_v27 }
  0xa8   :  { %v752_v40 = vunpack.i.h.bf16 %v957_v30  ;;  %v751_v41 = vunpack.i.l.bf16 %v957_v30 }
 0x16c   :  { %v685_v26 = vpop.f32.mrb[0].mxu0 }
 0x16d   :  { %v247_v28 = vadd.f32 %v685_v26, %v646_v25  ;;  %v223_v29 = vpop.f32.mrb[1].mxu0 }
 0x16e   :  { %v245_v31 = vadd.f32 %v646_v25, %v223_v29  ;;  %v686_v32 = vpop.f32.mrb[2].mxu0 }
 0x16f   :  { %v251_v33 = vmax.f32 %v247_v28, 0.0  ;;  %v248_v34 = vadd.f32 %v686_v32, %v646_v25  ;;  %v226_v37 = vpop.f32.mrb[3].mxu0  ;;  %v513_v28 = vadd.f32 %v512_v19, %v511_v8 }
 0x170   :  { %v249_v38 = vmax.f32 %v245_v31, 0.0  ;;  %v246_v39 = vadd.f32 %v646_v25, %v226_v37  ;;  %v504_v31 = vadd.f32 %v503_v4, %v502_v12 }
 0x171   :  { %v252_v43 = vmax.f32 %v248_v34, 0.0  ;;  %v275_v47 = vmul.f32 %v757_v36, %v251_v33  ;;  %v515_v37 = vadd.f32 1e-06, %v513_v28 }
 0x172   :  { %v250_v45 = vmax.f32 %v246_v39, 0.0  ;;  %v273_v49 = vmul.f32 %v751_v41, %v249_v38  ;;  %v514_v38 = vadd.f32 1e-06, %v504_v31 }
 0x173   :  { %v276_v46 = vmul.f32 %v758_v35, %v252_v43 }
 0x174   :  { %v274_v48 = vmul.f32 %v752_v40, %v250_v45 }
 0x175   :  { %v278_v50 = vpack.c.bf16 %v276_v46, %v275_v47 }
 0x176   :  { %v277_v52 = vpack.c.bf16 %v274_v48, %v273_v49  ;;  %v530_v49 = vld [vmem:[%s1058_s6] sm:$0xff] }
 0x177   :  { %v287_v54 = vshrl.u32 %v278_v50, 16  ;;  %v290_v59 = vshll.u32 %v278_v50, 16  ;;  %v531_v50 = vld [vmem:[%s1058_s6 + $0x8] sm:$0xff] }
 0x178   :  { %v280_v57 = vshrl.u32 %v277_v52, 16  ;;  %v283_v63 = vshll.u32 %v277_v52, 16  ;;  %v723_v51 = vpack.c.bf16 %v531_v50, %v530_v49  ;;  %v822_v52 = vmov 0.0|0.0  }
 0x179   :  { %v289_v58 = vrot.slane %v287_v54, 7  ;;  %722 = vmatprep.subr.bf16.mxu0 %v822_v52  ;;  %v533_v54 = vld [vmem:[%s1058_s6 + $0x18] sm:$0xff] }
 0x17a   :  { %v282_v62 = vrot.slane %v280_v57, 7  ;;  %724 = vmatpush3.bf16.msra.mxu0 %v723_v51  ;;  %v726_v56 = vpack.c.bf16 %v533_v54, %v532_v53  ;;  %v534_v57 = vld [vmem:[%s1058_s6 + $0x20] sm:$0xff] }
 0x17b   :  { %v292_v2 = vor.u32 %v290_v59, %v289_v58  ;;  %v303_v3 = vsel %vm975_vm3, %v289_v58, 0  ;;  %725 = vmatprep.subr.bf16.mxu0 %v822_v52  ;;  %v535_v58 = vld [vmem:[%s1058_s6 + $0x28] sm:$0xff] }
 0x17c   :  { %v285_v5 = vor.u32 %v283_v63, %v282_v62  ;;  %v302_v6 = vsel %vm975_vm3, %v282_v62, 0  ;;  %v324_v11 = vshll.u32 %v303_v3, 16  ;;  %v340_v29 = vrot.slane %v303_v3, 1  ;;  %v655_v63 = vld [vmem:[%s1057_s5] ss:$0 sm:$0xff] }
 0x17d   :  { %v301_v7 = vsel %vm975_vm3, 0, %v292_v2  ;;  %v312_v14 = vshll.u32 %v302_v6, 16  ;;  %v337_v32 = vrot.slane %v302_v6, 1  ;;  %v729_v59 = vpack.c.bf16 %v535_v58, %v534_v57 }
 0x17e   :  { %v300_v9 = vsel %vm975_vm3, 0, %v285_v5  ;;  %v319_v10 = vshll.u32 %v301_v7, 16  ;;  %v317_v15 = vshrl.u32 %v301_v7, 16  ;;  %v326_v21 = vrot.slane %v324_v11, 1  ;;  %727 = vmatpush3.bf16.msra.mxu0 %v726_v56 }
 0x17f   :  { %v307_v13 = vshll.u32 %v300_v9, 16  ;;  %v305_v17 = vshrl.u32 %v300_v9, 16  ;;  %v314_v22 = vrot.slane %v312_v14, 1  ;;  %v339_v24 = vrot.slane %v301_v7, 1  ;;  %728 = vmatprep.subr.bf16.mxu0 %v822_v52 }
 0x180   :  { %v321_v16 = vrot.slane %v319_v10, 1  ;;  %v336_v26 = vrot.slane %v300_v9, 1  ;;  %v732_v62 = vpack.c.bf16 %v537_v61, %v536_v60 }
 0x181   :  { %v309_v18 = vrot.slane %v307_v13, 1  ;;  %v341_v33 = vsel %vm103_vm0, %v339_v24, %v340_v29 }
 0x182   :  { %v322_v20 = vor.u32 %v321_v16, %v317_v15  ;;  %v338_v34 = vsel %vm103_vm0, %v336_v26, %v337_v32  ;;  %730 = vmatpush3.bf16.msra.mxu0 %v729_v59  ;;  %vm823_vm0 = vmmov 0  }
 0x183   :  { %v310_v0 = vor.u32 %v309_v18, %v305_v17  ;;  %731 = vmatprep.subr.bf16.mxu0 %v822_v52  ;;  %719 = vmatprep.mubr.msk.f32.mxu0 %vm823_vm0, %v819_v55 }
 0x184   :  { %v327_v23 = vsel %vm74_vm1, %v322_v20, %v326_v21 }
 0x185   :  { %330 = vrot.lane.b32.xlu0 %v327_v23, %s820_s4  ;;  %v315_v25 = vsel %vm74_vm1, %v310_v0, %v314_v22  ;;  %vm346_vm1 = vcmask 261120  }
 0x186   :  { %328 = vrot.lane.b32.xlu1 %v315_v25, %s820_s4  ;;  %733 = vmatpush3.bf16.msra.mxu0 %v732_v62 }
 0x189   :  { %344 = vrot.lane.b32.xlu0 %v341_v33, %s821_s15 }
 0x18a   :  { %342 = vrot.lane.b32.xlu1 %v338_v34, %s821_s15 }
 0x18d   :  { %523 = vperm.xlu0 %747, %v515_v37  }
 0x18e   :  { %518 = vperm.xlu1 %753, %v514_v38   ;;  %v656_v38 = vld [vmem:[%s1059_s7] ss:$0 sm:$0xff] }
 0x1f7   :  { %v331_v39 = vpop.permute.xlu0 %330 }
 0x1f8   :  { %v329_v42 = vpop.permute.xlu1 %328  ;;  %v350_v46 = vsel %vm346_vm1, %v301_v7, %v331_v39 }
 0x1f9   :  { %v348_v44 = vsel %vm346_vm1, %v300_v9, %v329_v42 }
 0x1fb   :  { %v345_v43 = vpop.permute.xlu0 %344 }
 0x1fc   :  { %v343_v45 = vpop.permute.xlu1 %342  ;;  %v355_v48 = vsel %vm351_vm4, %v350_v46, %v345_v43 }
 0x1fd   :  { %v353_v47 = vsel %vm351_vm4, %v348_v44, %v343_v45 }
 0x1fe   :  { %699 = vmatprep.mubr.msk.bf16.mxu1 %vm404_vm5, %v353_v47 }
 0x1ff   :  { %700 = vmatmul.mubr.msk.bf16.vlgmr.msra.gmra.mrb[0].mxu1 %vm404_vm5, %v355_v48 }
 0x20c   :  { %v524_v19 = vpop.permute.xlu0 %523 }
 0x20d   :  { %v519_v4 = vpop.permute.xlu1 %518  ;;  %771 = vrcp.f32 %v524_v19 }
 0x20e   :  { %773 = vrcp.f32 %v519_v4 }
 0x217   :  { %v772_v29 = vpop.eup %771 }
 0x218   :  { %v774_v32 = vpop.eup %773 }
 0x2d2   :  { %v701_v1 = vpop.f32.mrb[0].mxu1 }
 0x2d3   :  { %v467_v2 = vadd.f32 %v701_v1, %v655_v63  ;;  %v443_v3 = vpop.f32.mrb[1].mxu1 }
 0x2d4   :  { %v465_v5 = vadd.f32 %v655_v63, %v443_v3  ;;  %v702_v6 = vpop.f32.mrb[2].mxu1 }
 0x2d5   :  { %v471_v7 = vmax.f32 %v467_v2, 0.0  ;;  %v468_v8 = vadd.f32 %v702_v6, %v655_v63  ;;  %v446_v9 = vpop.f32.mrb[3].mxu1 }
 0x2d6   :  { %v469_v10 = vmax.f32 %v465_v5, 0.0  ;;  %v466_v11 = vadd.f32 %v655_v63, %v446_v9 }
 0x2d7   :  { %v475_v12 = vmul.f32 %v757_v36, %v471_v7  ;;  %v472_v13 = vmax.f32 %v468_v8, 0.0 }
 0x2d8   :  { %v473_v55 = vmul.f32 %v751_v41, %v469_v10  ;;  %v470_v14 = vmax.f32 %v466_v11, 0.0 }
 0x2d9   :  { %v476_v15 = vmul.f32 %v758_v35, %v472_v13  ;;  %v486_v17 = vsel %vm351_vm4, %v475_v12, 0.0 }
 0x2da   :  { %v474_v16 = vmul.f32 %v752_v40, %v470_v14  ;;  %v477_v20 = vsel %vm351_vm4, %v473_v55, 0.0 }
 0x2db   :  { %v487_v18 = vsel %vm351_vm4, %v476_v15, 0.0 }
 0x2dc   :  { %v488_v21 = vadd.f32 %v487_v18, %v486_v17  ;;  %v478_v36 = vsel %vm351_vm4, %v474_v16, 0.0 }
 0x2dd   :  { %v479_v0 = vadd.f32 %v478_v36, %v477_v20 }
 0x2de   :  { %v489_v41 = vrot.slane %v488_v21, 4 }
 0x2df   :  { %v480_v22 = vrot.slane %v479_v0, 4 }
 0x2e0   :  { %v490_v27 = vadd.f32 %v489_v41, %v488_v21 }
 0x2e1   :  { %v481_v35 = vadd.f32 %v480_v22, %v479_v0 }
 0x2e2   :  { %v491_v30 = vrot.slane %v490_v27, 2 }
 0x2e3   :  { %v482_v40 = vrot.slane %v481_v35, 2 }
 0x2e4   :  { %v492_v23 = vadd.f32 %v491_v30, %v490_v27 }
 0x2e5   :  { %v483_v24 = vadd.f32 %v482_v40, %v481_v35 }
 0x2e6   :  { %v493_v25 = vrot.slane %v492_v23, 1 }
 0x2e7   :  { %v484_v26 = vrot.slane %v483_v24, 1 }
 0x2e8   :  { %v494_v28 = vadd.f32 %v493_v25, %v492_v23 }
 0x2e9   :  { %v485_v31 = vadd.f32 %v484_v26, %v483_v24 }
 0x2ea   :  { %v529_v33 = vmul.f32 %v772_v29, %v494_v28 }
 0x2eb   :  { %v527_v34 = vmul.f32 %v774_v32, %v485_v31 }
 0x2ed   :  { %v548_v37 = vsel %vm547_vm6, %v529_v33, %v527_v34 }
 0x2ee   :  { %720 = vmatmul.mubr.msk.f32.vlgmr.msra.gmra.mrb[4].mxu0 %vm351_vm4, %v548_v37 }
 0x3c1   :  { %v617_v39 = vpop.f32.mrb[4].mxu0 }
 0x3c2   :  { %v618_v42 = vadd.f32 %v656_v38, %v617_v39  ;;  %v721_v43 = vpop.f32.mrb[5].mxu0 }
 0x3c4   :  { %622 = vst.msk [vmem:[#allocation4] sm:$0x3] %vm621_vm7, %v618_v42 }
 0x3c5   :  { %798 = shalt.err (!%p795_p9)
}
 0x3c6   :  { %s799_s3 = scalar_lea.hbm %s1060_s8, 32 }
 0x3c7   :  { %p800_p10 = scmp.ne.s32.totalorder %s1060_s8, %s799_s3  ;;  %p803_p11 = scmp.lt.u32.totalorder %s799_s3, %s1060_s8 }
 0x3c9   :  { %p805_p12 = pnand %p803_p11, %p800_p10 }
 0x3cb   :  { %808 = shalt.err (!%p805_p12)
}
 0x3cc   :  { %632 = dma.vmem_to_hbm [thread:$0]  %s630_s11, 32, %s1060_s8, [#allocation5]  }
 0x3cd   :  { %811 = dma.done.wait [#allocation5], 32  }
 0x3ce   :  { %812 = vsyncadd [#allocation5], 4294967264 }
 0x3cf   :  { %636 = vsyncpa [#allocation5], 1 }

</bundles_post_ra>
